<compile_context>
chip_gen: v7x
topology: tpu7x:2x2x1
jax: 0.10.0
libtpu: 0.0.40
codegen_flags: <defaults>
</compile_context>

<pallas_src>
import functools

import jax
import jax.numpy as jnp
from jax.experimental import pallas as pl
from jax.experimental.pallas import tpu as pltpu


def _round_up(a, b):
    return ((a + b - 1) // b) * b


def _spectral_loss_kernel(pred_ref, targ_ref, d_ref, fw_ref, out_ref,
                          yp_ref, yt_ref, *, hwfp):
    """One grid step: T images per stream -> (1, hwfp) weighted |Δmag| partial sum.

    pred_ref / targ_ref : (T, H*W)       bf16  flattened images
    d_ref               : (H*W, 2*hwfp)  bf16  dense 2D-rfft operator [Re | Im]
    fw_ref              : (1, hwfp)      f32   frequency weights (0 on padded lanes)
    out_ref             : (1, hwfp)      f32   per-step partial sums
    yp_ref / yt_ref     : (T, 2*hwfp)    f32   VMEM staging for the DFT results
    """
    d = d_ref[...]
    # Full 2-D DFT of every image in the tile: one deep (K = H*W) matmul per stream.
    yp_ref[...] = jnp.dot(pred_ref[...], d, preferred_element_type=jnp.float32)
    yt_ref[...] = jnp.dot(targ_ref[...], d, preferred_element_type=jnp.float32)

    # Lane-aligned real/imag halves -> magnitudes (batched elementwise, no per-image loop).
    pr = yp_ref[:, :hwfp]
    pi = yp_ref[:, hwfp:]
    tr = yt_ref[:, :hwfp]
    ti = yt_ref[:, hwfp:]
    pm = jnp.sqrt(pr * pr + pi * pi)                         # (T, hwfp)
    tm = jnp.sqrt(tr * tr + ti * ti)                         # (T, hwfp)

    weighted = fw_ref[...] * jnp.abs(pm - tm)                # (T, hwfp)
    # Single sublane reduce per step; lane-dense (1, hwfp) store.
    out_ref[...] = jnp.sum(weighted, axis=0, keepdims=True)


def spectral_loss(pred, target, weight_high_freq=2.0):
    """Pallas equivalent of SpectralLoss.forward(pred, target)."""
    assert pred.shape == target.shape
    B, C, H, W = pred.shape
    HW = H * W
    Wf = W // 2 + 1
    HWf = H * Wf
    HWfp = _round_up(HWf, 128)                 # lane-packed rfft2 output axis
    n_img = B * C

    # Dense 2D-DFT operator must fit comfortably in VMEM (small-image fast path).
    d_bytes = HW * (2 * HWfp) * 2
    assert d_bytes <= (8 << 20), "spectral_loss: image too large for dense 2D-DFT path"
    # TODO(synk): add a separable row/column DFT fallback for images with H*W >~ 2K.

    # ---- dense 2D-rfft operator (ortho norm), bf16, lane-padded -------------
    y = jnp.arange(H, dtype=jnp.float32)
    x = jnp.arange(W, dtype=jnp.float32)
    ky = jnp.arange(H, dtype=jnp.float32)
    kx = jnp.arange(Wf, dtype=jnp.float32)
    ph_y = (2.0 * jnp.pi / H) * jnp.outer(y, ky)             # (H, H)  [y, ky]
    ph_x = (2.0 * jnp.pi / W) * jnp.outer(x, kx)             # (W, Wf) [x, kx]
    phase = (ph_y[:, None, :, None] + ph_x[None, :, None, :]).reshape(HW, HWf)
    scale = 1.0 / jnp.sqrt(jnp.float32(HW))
    pad = HWfp - HWf
    d_re = jnp.pad(jnp.cos(phase) * scale, ((0, 0), (0, pad)))
    d_im = jnp.pad(-jnp.sin(phase) * scale, ((0, 0), (0, pad)))
    d_mat = jnp.concatenate([d_re, d_im], axis=1).astype(jnp.bfloat16)  # (HW, 2*HWfp)

    # ---- frequency weighting (zero on padded lanes -> exact sum) ------------
    fy = jnp.fft.fftfreq(H).astype(jnp.float32)[:, None]
    fx = jnp.fft.rfftfreq(W).astype(jnp.float32)[None, :]
    fw = 1.0 + (weight_high_freq - 1.0) * jnp.sqrt(fy * fy + fx * fx)   # (H, Wf)
    fw = jnp.pad(fw.reshape(1, HWf), ((0, 0), (0, pad))).astype(jnp.float32)

    # ---- flattened bf16 image streams (free row-major reshape) --------------
    xp = pred.reshape(n_img, HW).astype(jnp.bfloat16)
    xt = target.reshape(n_img, HW).astype(jnp.bfloat16)

    # ---- images per grid step ------------------------------------------------
    bytes_per_img = 2 * HW * 2                               # pred + target, bf16
    target_t = max(8, min(512, ((512 * 1024) // bytes_per_img) // 8 * 8))
    if n_img >= 2 * target_t:
        T = target_t                                         # many parallel steps
    elif n_img >= 16 and n_img % 16 == 0:
        T = n_img // 2                                       # 2 steps (v7x megacore)
    elif n_img % 8 == 0:
        T = min(n_img, target_t)                             # single step, no padding
    else:
        T = min(_round_up(n_img, 8), target_t)

    def run_tiles(xp_n, xt_n, tile):
        n = xp_n.shape[0]
        assert n % tile == 0 and tile % 8 == 0
        n_tiles = n // tile
        vmem_est = (2 * 2 * tile * HW * 2                    # double-buffered bf16 inputs
                    + 2 * HW * (2 * HWfp) * 2                # D (double-buffered), bf16
                    + 2 * tile * (2 * HWfp) * 4              # yp/yt f32 scratch
                    + 4 * HWfp * 4)                          # fw + out
        vmem_limit = int(min(56 << 20, max(2 * vmem_est, 16 << 20)))
        kernel = functools.partial(_spectral_loss_kernel, hwfp=HWfp)
        return pl.pallas_call(
            kernel,
            out_shape=jax.ShapeDtypeStruct((n_tiles, HWfp), jnp.float32),
            grid=(n_tiles,),
            in_specs=[
                pl.BlockSpec((tile, HW), lambda i: (i, 0)),       # pred tile
                pl.BlockSpec((tile, HW), lambda i: (i, 0)),       # target tile
                pl.BlockSpec((HW, 2 * HWfp), lambda i: (0, 0)),   # dense 2D-DFT operator
                pl.BlockSpec((1, HWfp), lambda i: (0, 0)),        # freq weights
            ],
            out_specs=pl.BlockSpec((1, HWfp), lambda i: (i, 0)),
            scratch_shapes=[
                pltpu.VMEM((tile, 2 * HWfp), jnp.float32),        # staged DFT (pred)
                pltpu.VMEM((tile, 2 * HWfp), jnp.float32),        # staged DFT (target)
            ],
            compiler_params=pltpu.CompilerParams(
                dimension_semantics=("parallel",),
                vmem_limit_bytes=vmem_limit),
        )(xp_n, xt_n, d_mat, fw)

    total = jnp.float32(0.0)
    n_main = (n_img // T) * T
    if n_main > 0:
        total = total + jnp.sum(run_tiles(xp[:n_main], xt[:n_main], T))
    rem = n_img - n_main
    if rem > 0:
        t_rem = _round_up(rem, 8)
        xp_r, xt_r = xp[n_main:], xt[n_main:]
        if t_rem != rem:
            # Only the (< T image) tail is zero-padded; |0 - 0| contributes nothing.
            xp_r = jnp.pad(xp_r, ((0, t_rem - rem), (0, 0)))
            xt_r = jnp.pad(xt_r, ((0, t_rem - rem), (0, 0)))
        total = total + jnp.sum(run_tiles(xp_r, xt_r, t_rem))

    # Mean over the true (unpadded) rfft2 output count.
    return total / jnp.float32(n_img * H * Wf)


def spectral_loss_ref(pred, target, weight_high_freq=2.0):
    """Pure-JAX reference mirroring the PyTorch module."""
    pred_fft = jnp.fft.rfft2(pred, norm="ortho")
    target_fft = jnp.fft.rfft2(target, norm="ortho")
    pred_mag = jnp.abs(pred_fft)
    target_mag = jnp.abs(target_fft)
    H, W = pred.shape[-2], pred.shape[-1]
    fy = jnp.fft.fftfreq(H)[:, None]
    fx = jnp.fft.rfftfreq(W)[None, :]
    freq_grid = jnp.sqrt(fy ** 2 + fx ** 2)
    freq_weight = 1.0 + (weight_high_freq - 1.0) * freq_grid
    spectral_diff = freq_weight[None, None] * jnp.abs(pred_mag - target_mag)
    return jnp.mean(spectral_diff)


if __name__ == "__main__":
    key = jax.random.PRNGKey(0)
    k1, k2 = jax.random.split(key)
    B, C, H, W = 2, 4, 16, 16
    pred = jax.random.normal(k1, (B, C, H, W), dtype=jnp.float32)
    target = jax.random.normal(k2, (B, C, H, W), dtype=jnp.float32)

    loss_fn = jax.jit(lambda p, t: spectral_loss(p, t, 2.0))
    loss = jax.block_until_ready(loss_fn(pred, target))
    ref = jax.block_until_ready(spectral_loss_ref(pred, target, 2.0))

    assert jnp.isfinite(loss), "kernel produced non-finite loss"
    # bf16 MXU operands (inputs + DFT matrix) cost ~1e-4..1e-3 relative error on
    # the mean-reduced scalar loss; accumulation and the magnitude path are f32.
    assert jnp.allclose(loss, ref, rtol=3e-3, atol=3e-4), (loss, ref)
    print("KERNEL_OK")
</pallas_src>

<mosaic_0001>
module attributes {stable_mosaic.version = 11 : i64} {
  func.func @_spectral_loss_kernel(%arg0: i32, %arg1: memref<8x256xbf16, #tpu.memory_space<vmem>>, %arg2: memref<8x256xbf16, #tpu.memory_space<vmem>>, %arg3: memref<256x512xbf16, #tpu.memory_space<vmem>>, %arg4: memref<1x256xf32, #tpu.memory_space<vmem>>, %arg5: memref<1x256xf32, #tpu.memory_space<vmem>>, %arg6: memref<8x512xf32, #tpu.memory_space<vmem>>, %arg7: memref<8x512xf32, #tpu.memory_space<vmem>>) attributes {dimension_semantics = [#tpu.dimension_semantics<parallel>], iteration_bounds = array<i64: 1>, scalar_prefetch = 0 : i64, scratch_operands = 2 : i64, tpu.core_type = #tpu.core_type<tc>, window_params = [{transform_indices = @transform_0, window_bounds = array<i64: 8, 256>}, {transform_indices = @transform_1, window_bounds = array<i64: 8, 256>}, {pipeline_mode = #tpu.pipeline_mode<synchronous>, transform_indices = @transform_2, window_bounds = array<i64: 256, 512>}, {pipeline_mode = #tpu.pipeline_mode<synchronous>, transform_indices = @transform_3, window_bounds = array<i64: 1, 256>}, {transform_indices = @transform_4, window_bounds = array<i64: 1, 256>}]} {
    %c0 = arith.constant 0 : index
    %c0_0 = arith.constant 0 : index
    %0 = vector.load %arg3[%c0, %c0_0] : memref<256x512xbf16, #tpu.memory_space<vmem>>, vector<256x512xbf16>
    %c0_1 = arith.constant 0 : index
    %c0_2 = arith.constant 0 : index
    %1 = vector.load %arg1[%c0_1, %c0_2] : memref<8x256xbf16, #tpu.memory_space<vmem>>, vector<8x256xbf16>
    %cst = arith.constant dense<0.000000e+00> : vector<8x512xf32>
    %2 = tpu.matmul %1, %0, %cst {dimension_numbers = #tpu.dot_dimension_numbers<[1], [0], [0], [1], [0, 0, 1, 1], [], []>} : vector<8x256xbf16>, vector<256x512xbf16>, vector<8x512xf32> -> vector<8x512xf32>
    %c0_3 = arith.constant 0 : index
    %c0_4 = arith.constant 0 : index
    %3 = vector.load %arg6[%c0_3, %c0_4] : memref<8x512xf32, #tpu.memory_space<vmem>>, vector<8x512xf32>
    tpu.vector_store %arg6[%c0_3, %c0_4], %2 {strides = array<i32>} : memref<8x512xf32, #tpu.memory_space<vmem>>, vector<8x512xf32>,
    %c0_5 = arith.constant 0 : index
    %c0_6 = arith.constant 0 : index
    %4 = vector.load %arg2[%c0_5, %c0_6] : memref<8x256xbf16, #tpu.memory_space<vmem>>, vector<8x256xbf16>
    %cst_7 = arith.constant dense<0.000000e+00> : vector<8x512xf32>
    %5 = tpu.matmul %4, %0, %cst_7 {dimension_numbers = #tpu.dot_dimension_numbers<[1], [0], [0], [1], [0, 0, 1, 1], [], []>} : vector<8x256xbf16>, vector<256x512xbf16>, vector<8x512xf32> -> vector<8x512xf32>
    %c0_8 = arith.constant 0 : index
    %c0_9 = arith.constant 0 : index
    %6 = vector.load %arg7[%c0_8, %c0_9] : memref<8x512xf32, #tpu.memory_space<vmem>>, vector<8x512xf32>
    tpu.vector_store %arg7[%c0_8, %c0_9], %5 {strides = array<i32>} : memref<8x512xf32, #tpu.memory_space<vmem>>, vector<8x512xf32>,
    %c0_10 = arith.constant 0 : index
    %c0_11 = arith.constant 0 : index
    %7 = vector.load %arg6[%c0_10, %c0_11] : memref<8x512xf32, #tpu.memory_space<vmem>>, vector<8x256xf32>
    %c0_12 = arith.constant 0 : index
    %c256 = arith.constant 256 : index
    %8 = vector.load %arg6[%c0_12, %c256] : memref<8x512xf32, #tpu.memory_space<vmem>>, vector<8x256xf32>
    %c0_13 = arith.constant 0 : index
    %c0_14 = arith.constant 0 : index
    %9 = vector.load %arg7[%c0_13, %c0_14] : memref<8x512xf32, #tpu.memory_space<vmem>>, vector<8x256xf32>
    %c0_15 = arith.constant 0 : index
    %c256_16 = arith.constant 256 : index
    %10 = vector.load %arg7[%c0_15, %c256_16] : memref<8x512xf32, #tpu.memory_space<vmem>>, vector<8x256xf32>
    %11 = arith.mulf %7, %7 : vector<8x256xf32>
    %12 = arith.mulf %8, %8 : vector<8x256xf32>
    %13 = arith.addf %11, %12 : vector<8x256xf32>
    %14 = math.sqrt %13 : vector<8x256xf32>
    %15 = arith.mulf %9, %9 : vector<8x256xf32>
    %16 = arith.mulf %10, %10 : vector<8x256xf32>
    %17 = arith.addf %15, %16 : vector<8x256xf32>
    %18 = math.sqrt %17 : vector<8x256xf32>
    %c0_17 = arith.constant 0 : index
    %c0_18 = arith.constant 0 : index
    %19 = vector.load %arg4[%c0_17, %c0_18] : memref<1x256xf32, #tpu.memory_space<vmem>>, vector<1x256xf32>
    %20 = arith.subf %14, %18 : vector<8x256xf32>
    %21 = math.absf %20 : vector<8x256xf32>
    %22 = vector.broadcast %19 : vector<1x256xf32> to vector<8x256xf32>
    %23 = arith.mulf %22, %21 : vector<8x256xf32>
    %cst_19 = arith.constant dense<0.000000e+00> : vector<256xf32>
    %24 = vector.multi_reduction <add>, %23, %cst_19 [0] : vector<8x256xf32> to vector<256xf32>
    %25 = vector.shape_cast %24 : vector<256xf32> to vector<1x256xf32>
    %c0_20 = arith.constant 0 : index
    %c0_21 = arith.constant 0 : index
    %26 = vector.load %arg5[%c0_20, %c0_21] : memref<1x256xf32, #tpu.memory_space<vmem>>, vector<1x256xf32>
    tpu.vector_store %arg5[%c0_20, %c0_21], %25 {strides = array<i32>} : memref<1x256xf32, #tpu.memory_space<vmem>>, vector<1x256xf32>,
    return
  }
  func.func @transform_0(%arg0: i32) -> (i32, i32) {
    %c0_i32 = arith.constant 0 : i32
    %c0_i32_0 = arith.constant 0 : i32
    return %arg0, %c0_i32 : i32, i32
  }
  func.func @transform_1(%arg0: i32) -> (i32, i32) {
    %c0_i32 = arith.constant 0 : i32
    %c0_i32_0 = arith.constant 0 : i32
    return %arg0, %c0_i32 : i32, i32
  }
  func.func @transform_2(%arg0: i32) -> (i32, i32) {
    %c0_i32 = arith.constant 0 : i32
    %c0_i32_0 = arith.constant 0 : i32
    %c0_i32_1 = arith.constant 0 : i32
    return %c0_i32, %c0_i32_0 : i32, i32
  }
  func.func @transform_3(%arg0: i32) -> (i32, i32) {
    %c0_i32 = arith.constant 0 : i32
    %c0_i32_0 = arith.constant 0 : i32
    %c0_i32_1 = arith.constant 0 : i32
    return %c0_i32, %c0_i32_0 : i32, i32
  }
  func.func @transform_4(%arg0: i32) -> (i32, i32) {
    %c0_i32 = arith.constant 0 : i32
    %c0_i32_0 = arith.constant 0 : i32
    return %arg0, %c0_i32 : i32, i32
  }
}

</mosaic_0001>

<bundles_post_ra>
// kernel: _lambda_.1
= control target key start
LH: loop header
LB: loop body
LE: loop exit
PB: predicated region body
PF: predicated region fallthrough
CT: control target
= control target key end

     0   :  { %s1365_s2 = inlined_call_operand.vmem [shape: bf16[256,512], index: 2, kind: input, shape index: {}]   ;;  %s1366_s0 = inlined_call_operand.vmem [shape: bf16[8,256], index: 0, kind: input, shape index: {}]   ;;  %s1367_s1 = inlined_call_operand.vmem [shape: bf16[8,256], index: 1, kind: input, shape index: {}]   ;;  %s1368_s3 = inlined_call_operand.vmem [shape: f32[1,256], index: 3, kind: input, shape index: {}]   ;;  %s1369_s4 = inlined_call_operand.vmem [shape: f32[1,256], index: 4, kind: output, shape index: {}]  }
   0x1   :  { %v900_v0 = vld [vmem:[%s1365_s2 + $0x4] ss:$16 sps:$4 sm:$0xff]   ;;  %v905_v1 = vld [vmem:[%s1365_s2 + $0xc] ss:$16 sps:$4 sm:$0xff]   ;;  %v911_v2 = vld [vmem:[%s1365_s2] ss:$16 sps:$4 sm:$0xff]  }
   0x2   :  { %409 = vmatprep.subr.bf16.mxu0 %v900_v0  ;;  %v916_v3 = vld [vmem:[%s1365_s2 + $0x8] ss:$16 sps:$4 sm:$0xff]   ;;  %450 = vmatprep.subr.bf16.mxu1 %v905_v1  ;;  %v922_v4 = vld [vmem:[%s1365_s2 + $0x24] ss:$16 sps:$4 sm:$0xff]   ;;  %v929_v5 = vld [vmem:[%s1365_s2 + $0x2c] ss:$16 sps:$4 sm:$0xff]  }
   0x3   :  { %410 = vmatpush1.bf16.msra.mxu0 %v911_v2  ;;  %451 = vmatpush1.bf16.msra.mxu1 %v916_v3  ;;  %v934_v6 = vld [vmem:[%s1365_s2 + $0x20] ss:$16 sps:$4 sm:$0xff]   ;;  %v940_v7 = vld [vmem:[%s1365_s2 + $0x28] ss:$16 sps:$4 sm:$0xff]   ;;  %v946_v8 = vld [vmem:[%s1365_s2 + $0x44] ss:$16 sps:$4 sm:$0xff]  }
   0x4   :  { %411 = vmatprep.subr.bf16.mxu0 %v922_v4  ;;  %452 = vmatprep.subr.bf16.mxu1 %v929_v5  ;;  %v951_v9 = vld [vmem:[%s1365_s2 + $0x4c] ss:$16 sps:$4 sm:$0xff]   ;;  %v956_v10 = vld [vmem:[%s1365_s2 + $0x40] ss:$16 sps:$4 sm:$0xff]   ;;  %v961_v11 = vld [vmem:[%s1365_s2 + $0x48] ss:$16 sps:$4 sm:$0xff]  }
   0x5   :  { %v968_v12 = vld [vmem:[%s1365_s2 + $0x64] ss:$16 sps:$4 sm:$0xff]   ;;  %v975_v13 = vld [vmem:[%s1365_s2 + $0x6c] ss:$16 sps:$4 sm:$0xff]   ;;  %v980_v14 = vld [vmem:[%s1365_s2 + $0x60] ss:$16 sps:$4 sm:$0xff]  }
   0x6   :  { %v987_v15 = vld [vmem:[%s1365_s2 + $0x68] ss:$16 sps:$4 sm:$0xff]   ;;  %v992_v16 = vld [vmem:[%s1365_s2 + $0x84] ss:$16 sps:$4 sm:$0xff]   ;;  %v999_v17 = vld [vmem:[%s1365_s2 + $0x8c] ss:$16 sps:$4 sm:$0xff]  }
   0x7   :  { %412 = vmatpush1.bf16.msra.mxu0 %v934_v6  ;;  %453 = vmatpush1.bf16.msra.mxu1 %v940_v7  ;;  %v1004_v18 = vld [vmem:[%s1365_s2 + $0x80] ss:$16 sps:$4 sm:$0xff]   ;;  %v1009_v19 = vld [vmem:[%s1365_s2 + $0x88] ss:$16 sps:$4 sm:$0xff]   ;;  %v1016_v20 = vld [vmem:[%s1365_s2 + $0xa4] ss:$16 sps:$4 sm:$0xff]  }
   0x8   :  { %413 = vmatprep.subr.bf16.mxu0 %v946_v8  ;;  %454 = vmatprep.subr.bf16.mxu1 %v951_v9  ;;  %v1023_v21 = vld [vmem:[%s1365_s2 + $0xac] ss:$16 sps:$4 sm:$0xff]   ;;  %v1028_v22 = vld [vmem:[%s1365_s2 + $0xa0] ss:$16 sps:$4 sm:$0xff]   ;;  %v1035_v23 = vld [vmem:[%s1365_s2 + $0xa8] ss:$16 sps:$4 sm:$0xff]  }
   0x9   :  { %v1040_v24 = vld [vmem:[%s1365_s2 + $0xc4] ss:$16 sps:$4 sm:$0xff]   ;;  %v1047_v25 = vld [vmem:[%s1365_s2 + $0xcc] ss:$16 sps:$4 sm:$0xff]   ;;  %v1052_v26 = vld [vmem:[%s1365_s2 + $0xc0] ss:$16 sps:$4 sm:$0xff]  }
   0xa   :  { %v1057_v27 = vld [vmem:[%s1365_s2 + $0xc8] ss:$16 sps:$4 sm:$0xff]   ;;  %v1064_v28 = vld [vmem:[%s1365_s2 + $0xe4] ss:$16 sps:$4 sm:$0xff]   ;;  %v1071_v29 = vld [vmem:[%s1365_s2 + $0xec] ss:$16 sps:$4 sm:$0xff]  }
   0xb   :  { %414 = vmatpush1.bf16.msra.mxu0 %v956_v10  ;;  %455 = vmatpush1.bf16.msra.mxu1 %v961_v11  ;;  %v1076_v30 = vld [vmem:[%s1365_s2 + $0xe0] ss:$16 sps:$4 sm:$0xff]   ;;  %v1083_v31 = vld [vmem:[%s1365_s2 + $0xe8] ss:$16 sps:$4 sm:$0xff]   ;;  %v1088_v32 = vld [vmem:[%s1365_s2 + $0x104] ss:$16 sps:$4 sm:$0xff]  }
   0xc   :  { %415 = vmatprep.subr.bf16.mxu0 %v968_v12  ;;  %456 = vmatprep.subr.bf16.mxu1 %v975_v13  ;;  %v1095_v33 = vld [vmem:[%s1365_s2 + $0x10c] ss:$16 sps:$4 sm:$0xff]   ;;  %v1100_v34 = vld [vmem:[%s1365_s2 + $0x100] ss:$16 sps:$4 sm:$0xff]   ;;  %v1105_v35 = vld [vmem:[%s1365_s2 + $0x108] ss:$16 sps:$4 sm:$0xff]  }
   0xd   :  { %v1112_v36 = vld [vmem:[%s1365_s2 + $0x124] ss:$16 sps:$4 sm:$0xff]   ;;  %v1119_v37 = vld [vmem:[%s1365_s2 + $0x12c] ss:$16 sps:$4 sm:$0xff]   ;;  %v1124_v38 = vld [vmem:[%s1365_s2 + $0x120] ss:$16 sps:$4 sm:$0xff]  }
   0xe   :  { %v1131_v39 = vld [vmem:[%s1365_s2 + $0x128] ss:$16 sps:$4 sm:$0xff]   ;;  %v1136_v40 = vld [vmem:[%s1365_s2 + $0x144] ss:$16 sps:$4 sm:$0xff]   ;;  %v1143_v41 = vld [vmem:[%s1365_s2 + $0x14c] ss:$16 sps:$4 sm:$0xff]  }
   0xf   :  { %416 = vmatpush1.bf16.msra.mxu0 %v980_v14  ;;  %457 = vmatpush1.bf16.msra.mxu1 %v987_v15  ;;  %v1148_v42 = vld [vmem:[%s1365_s2 + $0x140] ss:$16 sps:$4 sm:$0xff]   ;;  %v1153_v43 = vld [vmem:[%s1365_s2 + $0x148] ss:$16 sps:$4 sm:$0xff]   ;;  %v1160_v44 = vld [vmem:[%s1365_s2 + $0x164] ss:$16 sps:$4 sm:$0xff]  }
  0x10   :  { %417 = vmatprep.subr.bf16.mxu0 %v992_v16  ;;  %458 = vmatprep.subr.bf16.mxu1 %v999_v17  ;;  %v1167_v45 = vld [vmem:[%s1365_s2 + $0x16c] ss:$16 sps:$4 sm:$0xff]   ;;  %v81_v46 = vld [vmem:[%s1366_s0] sm:$0xff]  ;;  %v1182_v49 = vld [vmem:[%s1365_s2 + $0x168] ss:$16 sps:$4 sm:$0xff]  }
  0x11   :  { %v695_v47 = vcombine.high %v81_v46, %v81_v46  ;;  %v1177_v48 = vld [vmem:[%s1365_s2 + $0x160] ss:$16 sps:$4 sm:$0xff]   ;;  %v1189_v50 = vld [vmem:[%s1365_s2 + $0x184] ss:$16 sps:$4 sm:$0xff]   ;;  %v1194_v51 = vld [vmem:[%s1365_s2 + $0x18c] ss:$16 sps:$4 sm:$0xff]  }
  0x12   :  { %v1201_v52 = vld [vmem:[%s1365_s2 + $0x180] ss:$16 sps:$4 sm:$0xff]   ;;  %v1206_v53 = vld [vmem:[%s1365_s2 + $0x188] ss:$16 sps:$4 sm:$0xff]   ;;  %v1213_v54 = vld [vmem:[%s1365_s2 + $0x1a4] ss:$16 sps:$4 sm:$0xff]  }
  0x13   :  { %418 = vmatpush1.bf16.msra.mxu0 %v1004_v18  ;;  %459 = vmatpush1.bf16.msra.mxu1 %v1009_v19  ;;  %v1218_v55 = vld [vmem:[%s1365_s2 + $0x1ac] ss:$16 sps:$4 sm:$0xff]   ;;  %v1225_v56 = vld [vmem:[%s1365_s2 + $0x1a0] ss:$16 sps:$4 sm:$0xff]   ;;  %v1230_v57 = vld [vmem:[%s1365_s2 + $0x1a8] ss:$16 sps:$4 sm:$0xff]  }
  0x14   :  { %419 = vmatprep.subr.bf16.mxu0 %v1016_v20  ;;  %460 = vmatprep.subr.bf16.mxu1 %v1023_v21  ;;  %v1237_v58 = vld [vmem:[%s1365_s2 + $0x1c4] ss:$16 sps:$4 sm:$0xff]   ;;  %v1242_v59 = vld [vmem:[%s1365_s2 + $0x1cc] ss:$16 sps:$4 sm:$0xff]   ;;  %v1249_v60 = vld [vmem:[%s1365_s2 + $0x1c0] ss:$16 sps:$4 sm:$0xff]  }
  0x15   :  { %441 = vmatprep.mubr.bf16.mxu0 %v695_v47  ;;  %482 = vmatprep.mubr.bf16.mxu1 %v695_v47  ;;  %1374 = vst [vmem:[#allocation4_spill] sm:$0xff] %v1237_v58  ;;  %1375 = vst [vmem:[#allocation5_spill] sm:$0xff] %v1242_v59  ;;  %v1254_v61 = vld [vmem:[%s1365_s2 + $0x1c8] ss:$16 sps:$4 sm:$0xff]   ;;  %v1261_v62 = vld [vmem:[%s1365_s2 + $0x1e4] ss:$16 sps:$4 sm:$0xff]  }
  0x16   :  { %1376 = vst [vmem:[#allocation6_spill] sm:$0xff] %v1249_v60  ;;  %1377 = vst [vmem:[#allocation7_spill] sm:$0xff] %v1254_v61  ;;  %v1266_v63 = vld [vmem:[%s1365_s2 + $0x1ec] ss:$16 sps:$4 sm:$0xff]   ;;  %v1273_v47 = vld [vmem:[%s1365_s2 + $0x1e0] ss:$16 sps:$4 sm:$0xff]  }
  0x17   :  { %420 = vmatpush1.bf16.msra.mxu0 %v1028_v22  ;;  %461 = vmatpush1.bf16.msra.mxu1 %v1035_v23 }
  0x18   :  { %421 = vmatprep.subr.bf16.mxu0 %v1040_v24  ;;  %462 = vmatprep.subr.bf16.mxu1 %v1047_v25 }
  0x1b   :  { %422 = vmatpush1.bf16.msra.mxu0 %v1052_v26  ;;  %463 = vmatpush1.bf16.msra.mxu1 %v1057_v27 }
  0x1c   :  { %423 = vmatprep.subr.bf16.mxu0 %v1064_v28  ;;  %464 = vmatprep.subr.bf16.mxu1 %v1071_v29 }
  0x1f   :  { %424 = vmatpush1.bf16.msra.mxu0 %v1076_v30  ;;  %465 = vmatpush1.bf16.msra.mxu1 %v1083_v31 }
  0x20   :  { %425 = vmatprep.subr.bf16.mxu0 %v1088_v32  ;;  %466 = vmatprep.subr.bf16.mxu1 %v1095_v33 }
  0x23   :  { %426 = vmatpush1.bf16.msra.mxu0 %v1100_v34  ;;  %467 = vmatpush1.bf16.msra.mxu1 %v1105_v35 }
  0x24   :  { %427 = vmatprep.subr.bf16.mxu0 %v1112_v36  ;;  %468 = vmatprep.subr.bf16.mxu1 %v1119_v37 }
  0x27   :  { %428 = vmatpush1.bf16.msra.mxu0 %v1124_v38  ;;  %469 = vmatpush1.bf16.msra.mxu1 %v1131_v39 }
  0x28   :  { %429 = vmatprep.subr.bf16.mxu0 %v1136_v40  ;;  %470 = vmatprep.subr.bf16.mxu1 %v1143_v41 }
  0x2b   :  { %430 = vmatpush1.bf16.msra.mxu0 %v1148_v42  ;;  %471 = vmatpush1.bf16.msra.mxu1 %v1153_v43 }
  0x2c   :  { %431 = vmatprep.subr.bf16.mxu0 %v1160_v44  ;;  %472 = vmatprep.subr.bf16.mxu1 %v1167_v45 }
  0x2f   :  { %432 = vmatpush1.bf16.msra.mxu0 %v1177_v48  ;;  %473 = vmatpush1.bf16.msra.mxu1 %v1182_v49 }
  0x30   :  { %433 = vmatprep.subr.bf16.mxu0 %v1189_v50  ;;  %474 = vmatprep.subr.bf16.mxu1 %v1194_v51 }
  0x33   :  { %434 = vmatpush1.bf16.msra.mxu0 %v1201_v52  ;;  %475 = vmatpush1.bf16.msra.mxu1 %v1206_v53 }
  0x34   :  { %435 = vmatprep.subr.bf16.mxu0 %v1213_v54  ;;  %476 = vmatprep.subr.bf16.mxu1 %v1218_v55 }
  0x37   :  { %436 = vmatpush1.bf16.msra.mxu0 %v1225_v56  ;;  %477 = vmatpush1.bf16.msra.mxu1 %v1230_v57 }
  0x38   :  { %437 = vmatprep.subr.bf16.mxu0 %v1237_v58  ;;  %478 = vmatprep.subr.bf16.mxu1 %v1242_v59  ;;  %v1278_v59 = vld [vmem:[%s1365_s2 + $0x1e8] ss:$16 sps:$4 sm:$0xff]   ;;  %v694_v58 = vcombine.low %v81_v46, %v81_v46 }
  0x3b   :  { %438 = vmatpush1.bf16.msra.mxu0 %v1249_v60  ;;  %479 = vmatpush1.bf16.msra.mxu1 %v1254_v61  ;;  %v1285_v60 = vld [vmem:[%s1367_s1] sm:$0xff] }
  0x3c   :  { %439 = vmatprep.subr.bf16.mxu0 %v1261_v62  ;;  %480 = vmatprep.subr.bf16.mxu1 %v1266_v63  ;;  %v761_v61 = vcombine.high %v1285_v60, %v1285_v60 }
  0x3f   :  { %440 = vmatpush1.bf16.msra.mxu0 %v1273_v47  ;;  %481 = vmatpush1.bf16.msra.mxu1 %v1278_v59 }
  0x40   :  { %503 = vmatprep.subr.bf16.mxu0 %v900_v0  ;;  %544 = vmatprep.subr.bf16.mxu1 %v905_v1  ;;  %v1378_v0 = vld [vmem:[#allocation4_spill] sm:$0xff]  ;;  %v1379_v1 = vld [vmem:[#allocation5_spill] sm:$0xff] }
  0x42   :  { %442 = vmatmul.mubr.bf16.vlgmr.msra.gmra.mrb[0].mxu0 %v694_v58  ;;  %483 = vmatmul.mubr.bf16.vlgmr.msra.gmra.mrb[0].mxu1 %v694_v58 }
  0x43   :  { %504 = vmatpush1.bf16.msra.mxu0 %v911_v2  ;;  %545 = vmatpush1.bf16.msra.mxu1 %v916_v3  ;;  %v1380_v2 = vld [vmem:[#allocation6_spill] sm:$0xff]  ;;  %v1381_v3 = vld [vmem:[#allocation7_spill] sm:$0xff] }
  0x44   :  { %505 = vmatprep.subr.bf16.mxu0 %v922_v4  ;;  %546 = vmatprep.subr.bf16.mxu1 %v929_v5  ;;  %v760_v4 = vcombine.low %v1285_v60, %v1285_v60 }
  0x45   :  { %535 = vmatprep.mubr.bf16.mxu0 %v761_v61  ;;  %576 = vmatprep.mubr.bf16.mxu1 %v761_v61 }
  0x47   :  { %506 = vmatpush1.bf16.msra.mxu0 %v934_v6  ;;  %547 = vmatpush1.bf16.msra.mxu1 %v940_v7 }
  0x48   :  { %507 = vmatprep.subr.bf16.mxu0 %v946_v8  ;;  %548 = vmatprep.subr.bf16.mxu1 %v951_v9 }
  0x4b   :  { %508 = vmatpush1.bf16.msra.mxu0 %v956_v10  ;;  %549 = vmatpush1.bf16.msra.mxu1 %v961_v11 }
  0x4c   :  { %509 = vmatprep.subr.bf16.mxu0 %v968_v12  ;;  %550 = vmatprep.subr.bf16.mxu1 %v975_v13 }
  0x4f   :  { %510 = vmatpush1.bf16.msra.mxu0 %v980_v14  ;;  %551 = vmatpush1.bf16.msra.mxu1 %v987_v15 }
  0x50   :  { %511 = vmatprep.subr.bf16.mxu0 %v992_v16  ;;  %552 = vmatprep.subr.bf16.mxu1 %v999_v17 }
  0x53   :  { %512 = vmatpush1.bf16.msra.mxu0 %v1004_v18  ;;  %553 = vmatpush1.bf16.msra.mxu1 %v1009_v19 }
  0x54   :  { %513 = vmatprep.subr.bf16.mxu0 %v1016_v20  ;;  %554 = vmatprep.subr.bf16.mxu1 %v1023_v21 }
  0x57   :  { %514 = vmatpush1.bf16.msra.mxu0 %v1028_v22  ;;  %555 = vmatpush1.bf16.msra.mxu1 %v1035_v23 }
  0x58   :  { %515 = vmatprep.subr.bf16.mxu0 %v1040_v24  ;;  %556 = vmatprep.subr.bf16.mxu1 %v1047_v25 }
  0x5b   :  { %516 = vmatpush1.bf16.msra.mxu0 %v1052_v26  ;;  %557 = vmatpush1.bf16.msra.mxu1 %v1057_v27 }
  0x5c   :  { %517 = vmatprep.subr.bf16.mxu0 %v1064_v28  ;;  %558 = vmatprep.subr.bf16.mxu1 %v1071_v29 }
  0x5f   :  { %518 = vmatpush1.bf16.msra.mxu0 %v1076_v30  ;;  %559 = vmatpush1.bf16.msra.mxu1 %v1083_v31 }
  0x60   :  { %519 = vmatprep.subr.bf16.mxu0 %v1088_v32  ;;  %560 = vmatprep.subr.bf16.mxu1 %v1095_v33  ;;  %v643_v33 = vlaneseq }
  0x62   :  { %vm687_vm8 = vcmp.lt.s32.totalorder %v643_v33, 256 }
  0x63   :  { %520 = vmatpush1.bf16.msra.mxu0 %v1100_v34  ;;  %561 = vmatpush1.bf16.msra.mxu1 %v1105_v35 }
  0x64   :  { %521 = vmatprep.subr.bf16.mxu0 %v1112_v36  ;;  %562 = vmatprep.subr.bf16.mxu1 %v1119_v37  ;;  %v644_v36 = vshrl.u32 %v643_v33, 7 }
  0x67   :  { %522 = vmatpush1.bf16.msra.mxu0 %v1124_v38  ;;  %563 = vmatpush1.bf16.msra.mxu1 %v1131_v39  ;;  %v645_v39 = vsub.s32 0, %v644_v36 }
  0x68   :  { %523 = vmatprep.subr.bf16.mxu0 %v1136_v40  ;;  %564 = vmatprep.subr.bf16.mxu1 %v1143_v41  ;;  %v649_v40 = vsub.s32 1, %v644_v36 }
  0x6b   :  { %524 = vmatpush1.bf16.msra.mxu0 %v1148_v42  ;;  %565 = vmatpush1.bf16.msra.mxu1 %v1153_v43 }
  0x6c   :  { %525 = vmatprep.subr.bf16.mxu0 %v1160_v44  ;;  %566 = vmatprep.subr.bf16.mxu1 %v1167_v45 }
  0x6f   :  { %526 = vmatpush1.bf16.msra.mxu0 %v1177_v48  ;;  %567 = vmatpush1.bf16.msra.mxu1 %v1182_v49 }
  0x70   :  { %527 = vmatprep.subr.bf16.mxu0 %v1189_v50  ;;  %568 = vmatprep.subr.bf16.mxu1 %v1194_v51  ;;  %v637_v50 = vld [vmem:[%s1368_s3] sm:$0x3] }
  0x73   :  { %528 = vmatpush1.bf16.msra.mxu0 %v1201_v52  ;;  %569 = vmatpush1.bf16.msra.mxu1 %v1206_v53 }
  0x74   :  { %529 = vmatprep.subr.bf16.mxu0 %v1213_v54  ;;  %570 = vmatprep.subr.bf16.mxu1 %v1218_v55 }
  0x77   :  { %530 = vmatpush1.bf16.msra.mxu0 %v1225_v56  ;;  %571 = vmatpush1.bf16.msra.mxu1 %v1230_v57 }
  0x78   :  { %531 = vmatprep.subr.bf16.mxu0 %v1378_v0  ;;  %572 = vmatprep.subr.bf16.mxu1 %v1379_v1 }
  0x7b   :  { %532 = vmatpush1.bf16.msra.mxu0 %v1380_v2  ;;  %573 = vmatpush1.bf16.msra.mxu1 %v1381_v3 }
  0x7c   :  { %533 = vmatprep.subr.bf16.mxu0 %v1261_v62  ;;  %574 = vmatprep.subr.bf16.mxu1 %v1266_v63  ;;  %v650_v62 = vrot.slane %v637_v50, %v649_v40 }
  0x7f   :  { %534 = vmatpush1.bf16.msra.mxu0 %v1273_v47  ;;  %575 = vmatpush1.bf16.msra.mxu1 %v1278_v59  ;;  %v646_v59 = vrot.slane %v637_v50, %v645_v39 }
  0x82   :  { %536 = vmatmul.mubr.bf16.vlgmr.msra.gmra.mrb[4].mxu0 %v760_v4  ;;  %577 = vmatmul.mubr.bf16.vlgmr.msra.gmra.mrb[4].mxu1 %v760_v4 }
 0x115   :  { %v443_v5 = vpop.f32.mrb[0].mxu0  ;;  %v484_v6 = vpop.f32.mrb[0].mxu1 }
 0x116   :  { %v597_v7 = vmul.f32 %v443_v5, %v443_v5  ;;  %v599_v8 = vmul.f32 %v484_v6, %v484_v6  ;;  %v445_v9 = vpop.f32.mrb[1].mxu0  ;;  %v486_v10 = vpop.f32.mrb[1].mxu1  ;;  %v871_v6 = vmov 1966171168  }
 0x117   :  { %v598_v11 = vmul.f32 %v445_v9, %v445_v9  ;;  %v600_v12 = vmul.f32 %v486_v10, %v486_v10  ;;  %v447_v13 = vpop.f32.mrb[2].mxu0  ;;  %v488_v14 = vpop.f32.mrb[2].mxu1 }
 0x118   :  { %v601_v15 = vadd.f32 %v599_v8, %v597_v7  ;;  %v448_v16 = vpop.f32.mrb[3].mxu0  ;;  %v489_v17 = vpop.f32.mrb[3].mxu1  ;;  %v671_v7 = vunpack.c.l.s4 %v871_v6 }
 0x119   :  { %v602_v18 = vadd.f32 %v600_v12, %v598_v11 }
 0x11a   :  { %863 = vrsqrt.f32 %v601_v15  ;;  %vm605_vm0 = vcmp.eq.f32.partialorder %v601_v15, inf  ;;  %vm607_vm1 = vcmp.eq.f32.partialorder %v601_v15, 0.0  ;;  %v608_v42 = vand.u32 2147483648, %v601_v15 }
 0x11b   :  { %865 = vrsqrt.f32 %v602_v18  ;;  %vm612_vm2 = vcmp.eq.f32.partialorder %v602_v18, inf  ;;  %vm614_vm3 = vcmp.eq.f32.partialorder %v602_v18, 0.0  ;;  %v615_v45 = vand.u32 2147483648, %v602_v18 }
 0x11c   :  { %v672_v12 = vunpack.c.0.s8 %v671_v7 }
 0x11e   :  { %v675_v17 = vsub.s32 %v672_v12, %v644_v36 }
 0x124   :  { %v864_v34 = vpop.eup %863 }
 0x125   :  { %v866_v35 = vpop.eup %865  ;;  %v604_v37 = vmul.f32 %v864_v34, %v601_v15 }
 0x126   :  { %v611_v38 = vmul.f32 %v866_v35, %v602_v18 }
 0x127   :  { %v606_v44 = vsel %vm605_vm0, %v601_v15, %v604_v37 }
 0x128   :  { %v613_v48 = vsel %vm612_vm2, %v602_v18, %v611_v38  ;;  %v609_v54 = vsel %vm607_vm1, %v608_v42, %v606_v44 }
 0x129   :  { %v616_v57 = vsel %vm614_vm3, %v615_v45, %v613_v48 }
 0x155   :  { %v537_v19 = vpop.f32.mrb[4].mxu0  ;;  %v578_v20 = vpop.f32.mrb[4].mxu1 }
 0x156   :  { %v617_v21 = vmul.f32 %v537_v19, %v537_v19  ;;  %v619_v22 = vmul.f32 %v578_v20, %v578_v20  ;;  %v539_v23 = vpop.f32.mrb[5].mxu0  ;;  %v580_v24 = vpop.f32.mrb[5].mxu1 }
 0x157   :  { %v618_v25 = vmul.f32 %v539_v23, %v539_v23  ;;  %v620_v26 = vmul.f32 %v580_v24, %v580_v24  ;;  %v541_v27 = vpop.f32.mrb[6].mxu0  ;;  %v582_v28 = vpop.f32.mrb[6].mxu1 }
 0x158   :  { %v621_v29 = vadd.f32 %v619_v22, %v617_v21  ;;  %v542_v30 = vpop.f32.mrb[7].mxu0  ;;  %v583_v31 = vpop.f32.mrb[7].mxu1 }
 0x159   :  { %v622_v32 = vadd.f32 %v620_v26, %v618_v25 }
 0x15a   :  { %867 = vrsqrt.f32 %v621_v29  ;;  %vm625_vm4 = vcmp.eq.f32.partialorder %v621_v29, inf  ;;  %v628_v49 = vand.u32 2147483648, %v621_v29  ;;  %vm627_vm5 = vcmp.eq.f32.partialorder %v621_v29, 0.0 }
 0x15b   :  { %869 = vrsqrt.f32 %v622_v32  ;;  %vm632_vm6 = vcmp.eq.f32.partialorder %v622_v32, inf  ;;  %v635_v53 = vand.u32 2147483648, %v622_v32  ;;  %vm634_vm7 = vcmp.eq.f32.partialorder %v622_v32, 0.0 }
 0x164   :  { %v868_v41 = vpop.eup %867 }
 0x165   :  { %v870_v43 = vpop.eup %869  ;;  %v624_v46 = vmul.f32 %v868_v41, %v621_v29 }
 0x166   :  { %v631_v51 = vmul.f32 %v870_v43, %v622_v32 }
 0x167   :  { %v626_v52 = vsel %vm625_vm4, %v621_v29, %v624_v46 }
 0x168   :  { %v629_v55 = vsel %vm627_vm5, %v628_v49, %v626_v52  ;;  %v633_v56 = vsel %vm632_vm6, %v622_v32, %v631_v51 }
 0x169   :  { %v638_v58 = vsub.f32 %v609_v54, %v629_v55  ;;  %v636_v60 = vsel %vm634_vm7, %v635_v53, %v633_v56 }
 0x16a   :  { %v639_v61 = vsub.f32 %v616_v57, %v636_v60 }
 0x16b   :  { %v640_v63 = vand.u32 2147483647, %v638_v58 }
 0x16c   :  { %v641_v47 = vand.u32 2147483647, %v639_v61 }
 0x16d   :  { %v653_v0 = vmul.f32 %v646_v59, %v640_v63 }
 0x16e   :  { %v654_v1 = vmul.f32 %v650_v62, %v641_v47 }
 0x16f   :  { %v655_v2 = vrot.slane %v653_v0, 4 }
 0x170   :  { %v661_v3 = vrot.slane %v654_v1, 4 }
 0x171   :  { %v656_v4 = vadd.f32 %v655_v2, %v653_v0 }
 0x172   :  { %v662_v5 = vadd.f32 %v661_v3, %v654_v1 }
 0x173   :  { %v657_v8 = vrot.slane %v656_v4, 2 }
 0x174   :  { %v663_v9 = vrot.slane %v662_v5, 2 }
 0x175   :  { %v658_v10 = vadd.f32 %v657_v8, %v656_v4 }
 0x176   :  { %v664_v11 = vadd.f32 %v663_v9, %v662_v5 }
 0x177   :  { %v659_v13 = vrot.slane %v658_v10, 1 }
 0x178   :  { %v665_v14 = vrot.slane %v664_v11, 1 }
 0x179   :  { %v660_v15 = vadd.f32 %v659_v13, %v658_v10 }
 0x17a   :  { %v666_v16 = vadd.f32 %v665_v14, %v664_v11 }
 0x17c   :  { %v669_v18 = vcombine.low %v660_v15, %v666_v16 }
 0x17e   :  { %v676_v19 = vrot.slane %v669_v18, %v675_v17 }
 0x180   :  { %v683_v20 = vrot.slane %v676_v19, %v675_v17 }
 0x182   :  { %689 = vst.msk [vmem:[%s1369_s4] sm:$0x3] %vm687_vm8, %v683_v20 }

</bundles_post_ra>
